<compile_context>
chip_gen: v6e
topology: v6e:2x2x1
jax: 0.10.0
libtpu: 0.0.40
codegen_flags: <defaults>
</compile_context>

<pallas_src>
import math

import jax
import jax.numpy as jnp
from jax import lax
from jax.experimental import pallas as pl
from jax.experimental.pallas import tpu as pltpu


# ----------------------------------------------------------------------------
# Fused multi-stage kernel
# ----------------------------------------------------------------------------

def _make_mstcn_kernel(num_stages, num_layers, T_total, T_valid):
    """Builds the fused kernel body.  Per-grid-step it processes one batch
    element: (C_in, T_total) -> (num_classes, T_total).  T_valid is the
    original (un-padded) sequence length used for the conv boundary masks."""
    S, L = num_stages, num_layers
    dilations = [2 ** i for i in range(L)]

    def drl(x, m, col, wd_cat, bd, w1, b1, d):
        # x: (F, T_total).  Zero-padded dilated conv (k=3) taps via roll +
        # boundary mask (boundaries at the ORIGINAL length T_valid).
        if d < T_valid:
            xl = jnp.where(col >= d, pltpu.roll(x, d, axis=1), 0.0)            # x[:, t-d]
            xr = jnp.where(col < T_valid - d,
                           pltpu.roll(x, T_total - d, axis=1), 0.0)            # x[:, t+d]
        else:
            xl = jnp.zeros_like(x)
            xr = jnp.zeros_like(x)
        x3 = jnp.concatenate([xl, x, xr], axis=0)                              # (3F, T)
        # Single MXU contraction over all three taps.
        h = jnp.dot(wd_cat, x3, preferred_element_type=jnp.float32) + bd
        h = jnp.maximum(h, 0.0)                                                # ReLU
        o = jnp.dot(w1, h, preferred_element_type=jnp.float32) + b1
        # TODO(synk): nn.Dropout() treated as identity (eval-mode semantics).
        return (x + o) * m

    def stage(xin, m, col, w_in, b_in, wd, bd, w1, b1, w_out, b_out):
        act = jnp.dot(w_in, xin, preferred_element_type=jnp.float32) + b_in
        for l in range(L):
            act = drl(act, m, col, wd[l], bd[l], w1[l], b1[l], dilations[l])
        out = jnp.dot(w_out, act, preferred_element_type=jnp.float32) + b_out
        return out * m

    if S > 1:
        def kernel(x_ref, m_ref,
                   wi1_ref, bi1_ref, wd1_ref, bd1_ref, w11_ref, b11_ref,
                   wo1_ref, bo1_ref,
                   wiR_ref, biR_ref, wdR_ref, bdR_ref, w1R_ref, b1R_ref,
                   woR_ref, boR_ref,
                   o_ref):
            x = x_ref[...]                      # (C_in, T_total)
            m = m_ref[...]                      # (1, T_total)
            col = lax.broadcasted_iota(jnp.int32, (1, T_total), 1)   # hoisted once
            out = stage(x, m, col,
                        wi1_ref[...], bi1_ref[...],
                        wd1_ref[...], bd1_ref[...], w11_ref[...], b11_ref[...],
                        wo1_ref[...], bo1_ref[...])
            for s in range(S - 1):
                # Inter-stage sigmoid * mask fused here (EUP is otherwise idle).
                inp = jax.nn.sigmoid(out) * m
                out = stage(inp, m, col,
                            wiR_ref[s], biR_ref[s],
                            wdR_ref[s], bdR_ref[s], w1R_ref[s], b1R_ref[s],
                            woR_ref[s], boR_ref[s])
            o_ref[...] = jax.nn.sigmoid(out)
    else:
        def kernel(x_ref, m_ref,
                   wi1_ref, bi1_ref, wd1_ref, bd1_ref, w11_ref, b11_ref,
                   wo1_ref, bo1_ref,
                   o_ref):
            m = m_ref[...]
            col = lax.broadcasted_iota(jnp.int32, (1, T_total), 1)
            out = stage(x_ref[...], m, col,
                        wi1_ref[...], bi1_ref[...],
                        wd1_ref[...], bd1_ref[...], w11_ref[...], b11_ref[...],
                        wo1_ref[...], bo1_ref[...])
            o_ref[...] = jax.nn.sigmoid(out)

    return kernel


# ----------------------------------------------------------------------------
# Parameter init (PyTorch Conv1d-style, natural layout) and packing
# ----------------------------------------------------------------------------

def _init_conv1d(key, cin, cout, ksize):
    k1, k2 = jax.random.split(key)
    bound = 1.0 / math.sqrt(cin * ksize)
    w = jax.random.uniform(k1, (cout, cin, ksize), jnp.float32, -bound, bound)
    b = jax.random.uniform(k2, (cout,), jnp.float32, -bound, bound)
    return w, b


def init_single_stage(key, num_layers, num_f_maps, dim, num_classes):
    keys = jax.random.split(key, 2 + 2 * num_layers)
    w_in, b_in = _init_conv1d(keys[0], dim, num_f_maps, 1)
    layers = []
    for i in range(num_layers):
        wd, bd = _init_conv1d(keys[1 + 2 * i], num_f_maps, num_f_maps, 3)
        w1, b1 = _init_conv1d(keys[2 + 2 * i], num_f_maps, num_f_maps, 1)
        layers.append(dict(wd=wd, bd=bd, w1=w1, b1=b1))
    w_out, b_out = _init_conv1d(keys[-1], num_f_maps, num_classes, 1)
    return dict(w_in=w_in, b_in=b_in, layers=layers, w_out=w_out, b_out=b_out)


def init_multi_stage(key, num_stages, num_layers, num_f_maps, dim, num_classes):
    keys = jax.random.split(key, num_stages)
    stage1 = init_single_stage(keys[0], num_layers, num_f_maps, dim, num_classes)
    stages = [init_single_stage(keys[s], num_layers, num_f_maps,
                                num_classes, num_classes)
              for s in range(1, num_stages)]
    return dict(stage1=stage1, stages=stages)


def _pack_stage(p):
    """Reshape natural conv params into the fused-kernel layout."""
    F = p["w_in"].shape[0]
    # Dilated-conv weight (F, F, 3) -> (F, 3F) so all three taps are one dot:
    # column index k*F + i  <->  row k*F + i of the stacked [xl; xc; xr] input.
    wd = jnp.stack([jnp.transpose(l["wd"], (0, 2, 1)).reshape(F, 3 * F)
                    for l in p["layers"]])                       # (L, F, 3F)
    bd = jnp.stack([l["bd"][:, None] for l in p["layers"]])      # (L, F, 1)
    w1 = jnp.stack([l["w1"][:, :, 0] for l in p["layers"]])      # (L, F, F)
    b1 = jnp.stack([l["b1"][:, None] for l in p["layers"]])      # (L, F, 1)
    return dict(w_in=p["w_in"][:, :, 0], b_in=p["b_in"][:, None],
                wd=wd, bd=bd, w1=w1, b1=b1,
                w_out=p["w_out"][:, :, 0], b_out=p["b_out"][:, None])


def pack_params(params):
    packed = dict(stage1=_pack_stage(params["stage1"]))
    rest = [_pack_stage(sp) for sp in params["stages"]]
    if rest:
        packed["rest"] = {k: jnp.stack([r[k] for r in rest]) for k in rest[0]}
    return packed


# ----------------------------------------------------------------------------
# Forward (single pallas_call for the whole multi-stage model)
# ----------------------------------------------------------------------------

_PARAM_ORDER = ["w_in", "b_in", "wd", "bd", "w1", "b1", "w_out", "b_out"]


def multi_stage_forward(x, mask, params):
    B, D, T = x.shape
    S = 1 + len(params["stages"])
    packed = pack_params(params)
    s1 = packed["stage1"]
    F = s1["w_in"].shape[0]
    L = s1["wd"].shape[0]
    C = s1["w_out"].shape[0]

    # Pad the time axis up to a multiple of 128 so every tile is lane-dense and
    # every output store is an unmasked full-width vst.  The in-kernel conv
    # boundary masks use the original T, so the padded columns never influence
    # valid ones; they are sliced off below.
    T_pad = ((T + 127) // 128) * 128
    pad = T_pad - T
    xk = x.astype(jnp.float32)
    mask3 = mask[:, None, :].astype(jnp.float32)          # (B, 1, T)
    if pad:
        xk = jnp.pad(xk, ((0, 0), (0, 0), (0, pad)))
        mask3 = jnp.pad(mask3, ((0, 0), (0, 0), (0, pad)))

    def batched_spec(shape):
        n = len(shape) - 1
        return pl.BlockSpec((None,) + tuple(shape[1:]),
                            lambda b, n=n: (b,) + (0,) * n)

    def const_spec(arr):
        nd = arr.ndim
        return pl.BlockSpec(arr.shape, lambda b, nd=nd: (0,) * nd)

    inputs = [xk, mask3] + [s1[k] for k in _PARAM_ORDER]
    in_specs = [batched_spec(xk.shape), batched_spec(mask3.shape)] \
        + [const_spec(s1[k]) for k in _PARAM_ORDER]
    if S > 1:
        r = packed["rest"]
        inputs += [r[k] for k in _PARAM_ORDER]
        in_specs += [const_spec(r[k]) for k in _PARAM_ORDER]

    kernel = _make_mstcn_kernel(S, L, T_pad, T)

    out = pl.pallas_call(
        kernel,
        out_shape=jax.ShapeDtypeStruct((B, C, T_pad), jnp.float32),
        grid=(B,),
        in_specs=in_specs,
        out_specs=batched_spec((B, C, T_pad)),
        compiler_params=pltpu.CompilerParams(
            dimension_semantics=("parallel",)),   # batch axis -> both TCs on v7x
    )(*inputs)

    if pad:
        out = out[:, :, :T]
    # torch .squeeze(-2) only removes the dim if it has size 1
    if out.shape[-2] == 1:
        out = jnp.squeeze(out, axis=-2)
    return out


# ----------------------------------------------------------------------------
# Pure-JAX reference (lax conv) for verification
# ----------------------------------------------------------------------------

def _ref_conv1d(x, w, b, dilation=1, padding=0):
    y = lax.conv_general_dilated(
        x, w, window_strides=(1,), padding=[(padding, padding)],
        rhs_dilation=(dilation,), dimension_numbers=("NCH", "OIH", "NCH"))
    return y + b[None, :, None]


def _ref_single_stage(x, mask3, p):
    out = _ref_conv1d(x, p["w_in"], p["b_in"])
    for i, lp in enumerate(p["layers"]):
        d = 2 ** i
        h = jax.nn.relu(_ref_conv1d(out, lp["wd"], lp["bd"], dilation=d, padding=d))
        h = _ref_conv1d(h, lp["w1"], lp["b1"])
        out = (out + h) * mask3
    return _ref_conv1d(out, p["w_out"], p["b_out"]) * mask3


def _ref_multi_stage(x, mask, params):
    mask3 = mask[:, None, :]
    out = _ref_single_stage(x, mask3, params["stage1"])
    for sp in params["stages"]:
        out = _ref_single_stage(jax.nn.sigmoid(out) * mask3, mask3, sp)
    out = jax.nn.sigmoid(out)
    if out.shape[-2] == 1:
        out = jnp.squeeze(out, axis=-2)
    return out


# ----------------------------------------------------------------------------
# Main
# ----------------------------------------------------------------------------

if __name__ == "__main__":
    # Small hyper-parameters consistent with the module's forward.
    num_stages, num_layers, num_f_maps, dim, num_classes = 2, 3, 8, 4, 4
    B, T = 2, 16

    key = jax.random.PRNGKey(0)
    kx, km, kp = jax.random.split(key, 3)

    x = jax.random.normal(kx, (B, dim, T), dtype=jnp.float32)
    # 0/1 valid-frame mask as in MS-TCN, shape (B, T)
    mask = (jax.random.uniform(km, (B, T)) > 0.25).astype(jnp.float32)

    params = init_multi_stage(kp, num_stages, num_layers, num_f_maps,
                              dim, num_classes)

    out = jax.block_until_ready(multi_stage_forward(x, mask, params))
    ref = jax.block_until_ready(_ref_multi_stage(x, mask, params))

    assert out.shape == ref.shape, (out.shape, ref.shape)
    assert jnp.allclose(out, ref, atol=1e-5, rtol=1e-5), \
        float(jnp.max(jnp.abs(out - ref)))

    print("KERNEL_OK")
</pallas_src>

<mosaic_0001>
module attributes {stable_mosaic.version = 11 : i64} {
  func.func @kernel(%arg0: i32, %arg1: memref<1x4x128xf32, #tpu.memory_space<vmem>>, %arg2: memref<1x1x128xf32, #tpu.memory_space<vmem>>, %arg3: memref<8x4xf32, #tpu.memory_space<vmem>>, %arg4: memref<8x1xf32, #tpu.memory_space<vmem>>, %arg5: memref<3x8x24xf32, #tpu.memory_space<vmem>>, %arg6: memref<3x8x1xf32, #tpu.memory_space<vmem>>, %arg7: memref<3x8x8xf32, #tpu.memory_space<vmem>>, %arg8: memref<3x8x1xf32, #tpu.memory_space<vmem>>, %arg9: memref<4x8xf32, #tpu.memory_space<vmem>>, %arg10: memref<4x1xf32, #tpu.memory_space<vmem>>, %arg11: memref<1x8x4xf32, #tpu.memory_space<vmem>>, %arg12: memref<1x8x1xf32, #tpu.memory_space<vmem>>, %arg13: memref<1x3x8x24xf32, #tpu.memory_space<vmem>>, %arg14: memref<1x3x8x1xf32, #tpu.memory_space<vmem>>, %arg15: memref<1x3x8x8xf32, #tpu.memory_space<vmem>>, %arg16: memref<1x3x8x1xf32, #tpu.memory_space<vmem>>, %arg17: memref<1x4x8xf32, #tpu.memory_space<vmem>>, %arg18: memref<1x4x1xf32, #tpu.memory_space<vmem>>, %arg19: memref<1x4x128xf32, #tpu.memory_space<vmem>>) attributes {dimension_semantics = [#tpu.dimension_semantics<parallel>], iteration_bounds = array<i64: 2>, scalar_prefetch = 0 : i64, scratch_operands = 0 : i64, tpu.core_type = #tpu.core_type<tc>, window_params = [{transform_indices = @transform_0, window_bounds = array<i64: 1, 4, 128>}, {transform_indices = @transform_1, window_bounds = array<i64: 1, 1, 128>}, {pipeline_mode = #tpu.pipeline_mode<synchronous>, transform_indices = @transform_2, window_bounds = array<i64: 8, 4>}, {pipeline_mode = #tpu.pipeline_mode<synchronous>, transform_indices = @transform_3, window_bounds = array<i64: 8, 1>}, {pipeline_mode = #tpu.pipeline_mode<synchronous>, transform_indices = @transform_4, window_bounds = array<i64: 3, 8, 24>}, {pipeline_mode = #tpu.pipeline_mode<synchronous>, transform_indices = @transform_5, window_bounds = array<i64: 3, 8, 1>}, {pipeline_mode = #tpu.pipeline_mode<synchronous>, transform_indices = @transform_6, window_bounds = array<i64: 3, 8, 8>}, {pipeline_mode = #tpu.pipeline_mode<synchronous>, transform_indices = @transform_7, window_bounds = array<i64: 3, 8, 1>}, {pipeline_mode = #tpu.pipeline_mode<synchronous>, transform_indices = @transform_8, window_bounds = array<i64: 4, 8>}, {pipeline_mode = #tpu.pipeline_mode<synchronous>, transform_indices = @transform_9, window_bounds = array<i64: 4, 1>}, {pipeline_mode = #tpu.pipeline_mode<synchronous>, transform_indices = @transform_10, window_bounds = array<i64: 1, 8, 4>}, {pipeline_mode = #tpu.pipeline_mode<synchronous>, transform_indices = @transform_11, window_bounds = array<i64: 1, 8, 1>}, {pipeline_mode = #tpu.pipeline_mode<synchronous>, transform_indices = @transform_12, window_bounds = array<i64: 1, 3, 8, 24>}, {pipeline_mode = #tpu.pipeline_mode<synchronous>, transform_indices = @transform_13, window_bounds = array<i64: 1, 3, 8, 1>}, {pipeline_mode = #tpu.pipeline_mode<synchronous>, transform_indices = @transform_14, window_bounds = array<i64: 1, 3, 8, 8>}, {pipeline_mode = #tpu.pipeline_mode<synchronous>, transform_indices = @transform_15, window_bounds = array<i64: 1, 3, 8, 1>}, {pipeline_mode = #tpu.pipeline_mode<synchronous>, transform_indices = @transform_16, window_bounds = array<i64: 1, 4, 8>}, {pipeline_mode = #tpu.pipeline_mode<synchronous>, transform_indices = @transform_17, window_bounds = array<i64: 1, 4, 1>}, {transform_indices = @transform_18, window_bounds = array<i64: 1, 4, 128>}]} {
    %c0 = arith.constant 0 : index
    %c0_0 = arith.constant 0 : index
    %c0_1 = arith.constant 0 : index
    %0 = vector.load %arg1[%c0, %c0_0, %c0_1] : memref<1x4x128xf32, #tpu.memory_space<vmem>>, vector<1x4x128xf32>
    %1 = vector.shape_cast %0 : vector<1x4x128xf32> to vector<4x128xf32>
    %c0_2 = arith.constant 0 : index
    %c0_3 = arith.constant 0 : index
    %c0_4 = arith.constant 0 : index
    %2 = vector.load %arg2[%c0_2, %c0_3, %c0_4] : memref<1x1x128xf32, #tpu.memory_space<vmem>>, vector<1x1x128xf32>
    %3 = vector.shape_cast %2 : vector<1x1x128xf32> to vector<1x128xf32>
    %4 = tpu.iota {dimensions = array<i32: 1>} : vector<1x128xi32>
    %c0_5 = arith.constant 0 : index
    %c0_6 = arith.constant 0 : index
    %5 = vector.load %arg3[%c0_5, %c0_6] : memref<8x4xf32, #tpu.memory_space<vmem>>, vector<8x4xf32>
    %c0_7 = arith.constant 0 : index
    %c0_8 = arith.constant 0 : index
    %6 = vector.load %arg4[%c0_7, %c0_8] : memref<8x1xf32, #tpu.memory_space<vmem>>, vector<8x1xf32>
    %c0_9 = arith.constant 0 : index
    %c0_10 = arith.constant 0 : index
    %c0_11 = arith.constant 0 : index
    %7 = vector.load %arg5[%c0_9, %c0_10, %c0_11] : memref<3x8x24xf32, #tpu.memory_space<vmem>>, vector<3x8x24xf32>
    %c0_12 = arith.constant 0 : index
    %c0_13 = arith.constant 0 : index
    %c0_14 = arith.constant 0 : index
    %8 = vector.load %arg6[%c0_12, %c0_13, %c0_14] : memref<3x8x1xf32, #tpu.memory_space<vmem>>, vector<3x8x1xf32>
    %c0_15 = arith.constant 0 : index
    %c0_16 = arith.constant 0 : index
    %c0_17 = arith.constant 0 : index
    %9 = vector.load %arg7[%c0_15, %c0_16, %c0_17] : memref<3x8x8xf32, #tpu.memory_space<vmem>>, vector<3x8x8xf32>
    %c0_18 = arith.constant 0 : index
    %c0_19 = arith.constant 0 : index
    %c0_20 = arith.constant 0 : index
    %10 = vector.load %arg8[%c0_18, %c0_19, %c0_20] : memref<3x8x1xf32, #tpu.memory_space<vmem>>, vector<3x8x1xf32>
    %c0_21 = arith.constant 0 : index
    %c0_22 = arith.constant 0 : index
    %11 = vector.load %arg9[%c0_21, %c0_22] : memref<4x8xf32, #tpu.memory_space<vmem>>, vector<4x8xf32>
    %c0_23 = arith.constant 0 : index
    %c0_24 = arith.constant 0 : index
    %12 = vector.load %arg10[%c0_23, %c0_24] : memref<4x1xf32, #tpu.memory_space<vmem>>, vector<4x1xf32>
    %cst = arith.constant dense<0.000000e+00> : vector<8x128xf32>
    %13 = tpu.matmul %5, %1, %cst {dimension_numbers = #tpu.dot_dimension_numbers<[1], [0], [0], [1], [0, 0, 1, 1], [], []>} : vector<8x4xf32>, vector<4x128xf32>, vector<8x128xf32> -> vector<8x128xf32>
    %14 = vector.broadcast %6 : vector<8x1xf32> to vector<8x128xf32>
    %15 = arith.addf %13, %14 : vector<8x128xf32>
    %16 = vector.extract_strided_slice %7 {offsets = [0, 0, 0], sizes = [1, 8, 24], strides = [1, 1, 1]} : vector<3x8x24xf32> to vector<1x8x24xf32>
    %17 = vector.shape_cast %16 : vector<1x8x24xf32> to vector<8x24xf32>
    %18 = vector.extract_strided_slice %8 {offsets = [0, 0, 0], sizes = [1, 8, 1], strides = [1, 1, 1]} : vector<3x8x1xf32> to vector<1x8x1xf32>
    %19 = vector.shape_cast %18 : vector<1x8x1xf32> to vector<8x1xf32>
    %20 = vector.extract_strided_slice %9 {offsets = [0, 0, 0], sizes = [1, 8, 8], strides = [1, 1, 1]} : vector<3x8x8xf32> to vector<1x8x8xf32>
    %21 = vector.shape_cast %20 : vector<1x8x8xf32> to vector<8x8xf32>
    %22 = vector.extract_strided_slice %10 {offsets = [0, 0, 0], sizes = [1, 8, 1], strides = [1, 1, 1]} : vector<3x8x1xf32> to vector<1x8x1xf32>
    %23 = vector.shape_cast %22 : vector<1x8x1xf32> to vector<8x1xf32>
    %c1_i32 = arith.constant 1 : i32
    %24 = vector.broadcast %c1_i32 : i32 to vector<1x128xi32>
    %25 = arith.cmpi sge, %4, %24 : vector<1x128xi32>
    %c1_i32_25 = arith.constant 1 : i32
    %26 = tpu.dynamic_rotate %15 by %c1_i32_25 dim 1 : vector<8x128xf32>, i32 -> vector<8x128xf32>
    %cst_26 = arith.constant 0.000000e+00 : f32
    %27 = vector.shape_cast %25 : vector<1x128xi1> to vector<1x128xi1>
    %28 = vector.broadcast %27 : vector<1x128xi1> to vector<8x128xi1>
    %29 = vector.broadcast %cst_26 : f32 to vector<8x128xf32>
    %30 = arith.select %28, %26, %29 : vector<8x128xi1>, vector<8x128xf32>
    %c15_i32 = arith.constant 15 : i32
    %31 = vector.broadcast %c15_i32 : i32 to vector<1x128xi32>
    %32 = arith.cmpi slt, %4, %31 : vector<1x128xi32>
    %c127_i32 = arith.constant 127 : i32
    %33 = tpu.dynamic_rotate %15 by %c127_i32 dim 1 : vector<8x128xf32>, i32 -> vector<8x128xf32>
    %cst_27 = arith.constant 0.000000e+00 : f32
    %34 = vector.shape_cast %32 : vector<1x128xi1> to vector<1x128xi1>
    %35 = vector.broadcast %34 : vector<1x128xi1> to vector<8x128xi1>
    %36 = vector.broadcast %cst_27 : f32 to vector<8x128xf32>
    %37 = arith.select %35, %33, %36 : vector<8x128xi1>, vector<8x128xf32>
    %38 = tpu.concatenate %30, %15, %37 in 0 : vector<8x128xf32>, vector<8x128xf32>, vector<8x128xf32> -> vector<24x128xf32>
    %cst_28 = arith.constant dense<0.000000e+00> : vector<8x128xf32>
    %39 = tpu.matmul %17, %38, %cst_28 {dimension_numbers = #tpu.dot_dimension_numbers<[1], [0], [0], [1], [0, 0, 1, 1], [], []>} : vector<8x24xf32>, vector<24x128xf32>, vector<8x128xf32> -> vector<8x128xf32>
    %40 = vector.broadcast %19 : vector<8x1xf32> to vector<8x128xf32>
    %41 = arith.addf %39, %40 : vector<8x128xf32>
    %cst_29 = arith.constant 0.000000e+00 : f32
    %42 = vector.broadcast %cst_29 : f32 to vector<8x128xf32>
    %43 = arith.maximumf %41, %42 : vector<8x128xf32>
    %cst_30 = arith.constant dense<0.000000e+00> : vector<8x128xf32>
    %44 = tpu.matmul %21, %43, %cst_30 {dimension_numbers = #tpu.dot_dimension_numbers<[1], [0], [0], [1], [0, 0, 1, 1], [], []>} : vector<8x8xf32>, vector<8x128xf32>, vector<8x128xf32> -> vector<8x128xf32>
    %45 = vector.broadcast %23 : vector<8x1xf32> to vector<8x128xf32>
    %46 = arith.addf %44, %45 : vector<8x128xf32>
    %47 = arith.addf %15, %46 : vector<8x128xf32>
    %48 = vector.broadcast %3 : vector<1x128xf32> to vector<8x128xf32>
    %49 = arith.mulf %47, %48 : vector<8x128xf32>
    %50 = vector.extract_strided_slice %7 {offsets = [1, 0, 0], sizes = [1, 8, 24], strides = [1, 1, 1]} : vector<3x8x24xf32> to vector<1x8x24xf32>
    %51 = vector.shape_cast %50 : vector<1x8x24xf32> to vector<8x24xf32>
    %52 = vector.extract_strided_slice %8 {offsets = [1, 0, 0], sizes = [1, 8, 1], strides = [1, 1, 1]} : vector<3x8x1xf32> to vector<1x8x1xf32>
    %53 = vector.shape_cast %52 : vector<1x8x1xf32> to vector<8x1xf32>
    %54 = vector.extract_strided_slice %9 {offsets = [1, 0, 0], sizes = [1, 8, 8], strides = [1, 1, 1]} : vector<3x8x8xf32> to vector<1x8x8xf32>
    %55 = vector.shape_cast %54 : vector<1x8x8xf32> to vector<8x8xf32>
    %56 = vector.extract_strided_slice %10 {offsets = [1, 0, 0], sizes = [1, 8, 1], strides = [1, 1, 1]} : vector<3x8x1xf32> to vector<1x8x1xf32>
    %57 = vector.shape_cast %56 : vector<1x8x1xf32> to vector<8x1xf32>
    %c2_i32 = arith.constant 2 : i32
    %58 = vector.broadcast %c2_i32 : i32 to vector<1x128xi32>
    %59 = arith.cmpi sge, %4, %58 : vector<1x128xi32>
    %c2_i32_31 = arith.constant 2 : i32
    %60 = tpu.dynamic_rotate %49 by %c2_i32_31 dim 1 : vector<8x128xf32>, i32 -> vector<8x128xf32>
    %cst_32 = arith.constant 0.000000e+00 : f32
    %61 = vector.shape_cast %59 : vector<1x128xi1> to vector<1x128xi1>
    %62 = vector.broadcast %61 : vector<1x128xi1> to vector<8x128xi1>
    %63 = vector.broadcast %cst_32 : f32 to vector<8x128xf32>
    %64 = arith.select %62, %60, %63 : vector<8x128xi1>, vector<8x128xf32>
    %c14_i32 = arith.constant 14 : i32
    %65 = vector.broadcast %c14_i32 : i32 to vector<1x128xi32>
    %66 = arith.cmpi slt, %4, %65 : vector<1x128xi32>
    %c126_i32 = arith.constant 126 : i32
    %67 = tpu.dynamic_rotate %49 by %c126_i32 dim 1 : vector<8x128xf32>, i32 -> vector<8x128xf32>
    %cst_33 = arith.constant 0.000000e+00 : f32
    %68 = vector.shape_cast %66 : vector<1x128xi1> to vector<1x128xi1>
    %69 = vector.broadcast %68 : vector<1x128xi1> to vector<8x128xi1>
    %70 = vector.broadcast %cst_33 : f32 to vector<8x128xf32>
    %71 = arith.select %69, %67, %70 : vector<8x128xi1>, vector<8x128xf32>
    %72 = tpu.concatenate %64, %49, %71 in 0 : vector<8x128xf32>, vector<8x128xf32>, vector<8x128xf32> -> vector<24x128xf32>
    %cst_34 = arith.constant dense<0.000000e+00> : vector<8x128xf32>
    %73 = tpu.matmul %51, %72, %cst_34 {dimension_numbers = #tpu.dot_dimension_numbers<[1], [0], [0], [1], [0, 0, 1, 1], [], []>} : vector<8x24xf32>, vector<24x128xf32>, vector<8x128xf32> -> vector<8x128xf32>
    %74 = vector.broadcast %53 : vector<8x1xf32> to vector<8x128xf32>
    %75 = arith.addf %73, %74 : vector<8x128xf32>
    %cst_35 = arith.constant 0.000000e+00 : f32
    %76 = vector.broadcast %cst_35 : f32 to vector<8x128xf32>
    %77 = arith.maximumf %75, %76 : vector<8x128xf32>
    %cst_36 = arith.constant dense<0.000000e+00> : vector<8x128xf32>
    %78 = tpu.matmul %55, %77, %cst_36 {dimension_numbers = #tpu.dot_dimension_numbers<[1], [0], [0], [1], [0, 0, 1, 1], [], []>} : vector<8x8xf32>, vector<8x128xf32>, vector<8x128xf32> -> vector<8x128xf32>
    %79 = vector.broadcast %57 : vector<8x1xf32> to vector<8x128xf32>
    %80 = arith.addf %78, %79 : vector<8x128xf32>
    %81 = arith.addf %49, %80 : vector<8x128xf32>
    %82 = vector.broadcast %3 : vector<1x128xf32> to vector<8x128xf32>
    %83 = arith.mulf %81, %82 : vector<8x128xf32>
    %84 = vector.extract_strided_slice %7 {offsets = [2, 0, 0], sizes = [1, 8, 24], strides = [1, 1, 1]} : vector<3x8x24xf32> to vector<1x8x24xf32>
    %85 = vector.shape_cast %84 : vector<1x8x24xf32> to vector<8x24xf32>
    %86 = vector.extract_strided_slice %8 {offsets = [2, 0, 0], sizes = [1, 8, 1], strides = [1, 1, 1]} : vector<3x8x1xf32> to vector<1x8x1xf32>
    %87 = vector.shape_cast %86 : vector<1x8x1xf32> to vector<8x1xf32>
    %88 = vector.extract_strided_slice %9 {offsets = [2, 0, 0], sizes = [1, 8, 8], strides = [1, 1, 1]} : vector<3x8x8xf32> to vector<1x8x8xf32>
    %89 = vector.shape_cast %88 : vector<1x8x8xf32> to vector<8x8xf32>
    %90 = vector.extract_strided_slice %10 {offsets = [2, 0, 0], sizes = [1, 8, 1], strides = [1, 1, 1]} : vector<3x8x1xf32> to vector<1x8x1xf32>
    %91 = vector.shape_cast %90 : vector<1x8x1xf32> to vector<8x1xf32>
    %c4_i32 = arith.constant 4 : i32
    %92 = vector.broadcast %c4_i32 : i32 to vector<1x128xi32>
    %93 = arith.cmpi sge, %4, %92 : vector<1x128xi32>
    %c4_i32_37 = arith.constant 4 : i32
    %94 = tpu.dynamic_rotate %83 by %c4_i32_37 dim 1 : vector<8x128xf32>, i32 -> vector<8x128xf32>
    %cst_38 = arith.constant 0.000000e+00 : f32
    %95 = vector.shape_cast %93 : vector<1x128xi1> to vector<1x128xi1>
    %96 = vector.broadcast %95 : vector<1x128xi1> to vector<8x128xi1>
    %97 = vector.broadcast %cst_38 : f32 to vector<8x128xf32>
    %98 = arith.select %96, %94, %97 : vector<8x128xi1>, vector<8x128xf32>
    %c12_i32 = arith.constant 12 : i32
    %99 = vector.broadcast %c12_i32 : i32 to vector<1x128xi32>
    %100 = arith.cmpi slt, %4, %99 : vector<1x128xi32>
    %c124_i32 = arith.constant 124 : i32
    %101 = tpu.dynamic_rotate %83 by %c124_i32 dim 1 : vector<8x128xf32>, i32 -> vector<8x128xf32>
    %cst_39 = arith.constant 0.000000e+00 : f32
    %102 = vector.shape_cast %100 : vector<1x128xi1> to vector<1x128xi1>
    %103 = vector.broadcast %102 : vector<1x128xi1> to vector<8x128xi1>
    %104 = vector.broadcast %cst_39 : f32 to vector<8x128xf32>
    %105 = arith.select %103, %101, %104 : vector<8x128xi1>, vector<8x128xf32>
    %106 = tpu.concatenate %98, %83, %105 in 0 : vector<8x128xf32>, vector<8x128xf32>, vector<8x128xf32> -> vector<24x128xf32>
    %cst_40 = arith.constant dense<0.000000e+00> : vector<8x128xf32>
    %107 = tpu.matmul %85, %106, %cst_40 {dimension_numbers = #tpu.dot_dimension_numbers<[1], [0], [0], [1], [0, 0, 1, 1], [], []>} : vector<8x24xf32>, vector<24x128xf32>, vector<8x128xf32> -> vector<8x128xf32>
    %108 = vector.broadcast %87 : vector<8x1xf32> to vector<8x128xf32>
    %109 = arith.addf %107, %108 : vector<8x128xf32>
    %cst_41 = arith.constant 0.000000e+00 : f32
    %110 = vector.broadcast %cst_41 : f32 to vector<8x128xf32>
    %111 = arith.maximumf %109, %110 : vector<8x128xf32>
    %cst_42 = arith.constant dense<0.000000e+00> : vector<8x128xf32>
    %112 = tpu.matmul %89, %111, %cst_42 {dimension_numbers = #tpu.dot_dimension_numbers<[1], [0], [0], [1], [0, 0, 1, 1], [], []>} : vector<8x8xf32>, vector<8x128xf32>, vector<8x128xf32> -> vector<8x128xf32>
    %113 = vector.broadcast %91 : vector<8x1xf32> to vector<8x128xf32>
    %114 = arith.addf %112, %113 : vector<8x128xf32>
    %115 = arith.addf %83, %114 : vector<8x128xf32>
    %116 = vector.broadcast %3 : vector<1x128xf32> to vector<8x128xf32>
    %117 = arith.mulf %115, %116 : vector<8x128xf32>
    %cst_43 = arith.constant dense<0.000000e+00> : vector<4x128xf32>
    %118 = tpu.matmul %11, %117, %cst_43 {dimension_numbers = #tpu.dot_dimension_numbers<[1], [0], [0], [1], [0, 0, 1, 1], [], []>} : vector<4x8xf32>, vector<8x128xf32>, vector<4x128xf32> -> vector<4x128xf32>
    %119 = vector.broadcast %12 : vector<4x1xf32> to vector<4x128xf32>
    %120 = arith.addf %118, %119 : vector<4x128xf32>
    %121 = vector.broadcast %3 : vector<1x128xf32> to vector<4x128xf32>
    %122 = arith.mulf %120, %121 : vector<4x128xf32>
    %123 = arith.negf %122 : vector<4x128xf32>
    %124 = math.exp %123 : vector<4x128xf32>
    %cst_44 = arith.constant 1.000000e+00 : f32
    %125 = vector.broadcast %cst_44 : f32 to vector<4x128xf32>
    %126 = arith.addf %125, %124 : vector<4x128xf32>
    %127 = arith.divf %125, %126 : vector<4x128xf32>
    %128 = vector.broadcast %3 : vector<1x128xf32> to vector<4x128xf32>
    %129 = arith.mulf %127, %128 : vector<4x128xf32>
    %c0_45 = arith.constant 0 : index
    %c0_46 = arith.constant 0 : index
    %c0_47 = arith.constant 0 : index
    %130 = vector.load %arg11[%c0_45, %c0_46, %c0_47] : memref<1x8x4xf32, #tpu.memory_space<vmem>>, vector<1x8x4xf32>
    %131 = vector.shape_cast %130 : vector<1x8x4xf32> to vector<8x4xf32>
    %c0_48 = arith.constant 0 : index
    %c0_49 = arith.constant 0 : index
    %c0_50 = arith.constant 0 : index
    %132 = vector.load %arg12[%c0_48, %c0_49, %c0_50] : memref<1x8x1xf32, #tpu.memory_space<vmem>>, vector<1x8x1xf32>
    %133 = vector.shape_cast %132 : vector<1x8x1xf32> to vector<8x1xf32>
    %c0_51 = arith.constant 0 : index
    %c0_52 = arith.constant 0 : index
    %c0_53 = arith.constant 0 : index
    %c0_54 = arith.constant 0 : index
    %134 = vector.load %arg13[%c0_51, %c0_52, %c0_53, %c0_54] : memref<1x3x8x24xf32, #tpu.memory_space<vmem>>, vector<1x3x8x24xf32>
    %135 = vector.shape_cast %134 : vector<1x3x8x24xf32> to vector<3x8x24xf32>
    %c0_55 = arith.constant 0 : index
    %c0_56 = arith.constant 0 : index
    %c0_57 = arith.constant 0 : index
    %c0_58 = arith.constant 0 : index
    %136 = vector.load %arg14[%c0_55, %c0_56, %c0_57, %c0_58] : memref<1x3x8x1xf32, #tpu.memory_space<vmem>>, vector<1x3x8x1xf32>
    %137 = vector.shape_cast %136 : vector<1x3x8x1xf32> to vector<3x8x1xf32>
    %c0_59 = arith.constant 0 : index
    %c0_60 = arith.constant 0 : index
    %c0_61 = arith.constant 0 : index
    %c0_62 = arith.constant 0 : index
    %138 = vector.load %arg15[%c0_59, %c0_60, %c0_61, %c0_62] : memref<1x3x8x8xf32, #tpu.memory_space<vmem>>, vector<1x3x8x8xf32>
    %139 = vector.shape_cast %138 : vector<1x3x8x8xf32> to vector<3x8x8xf32>
    %c0_63 = arith.constant 0 : index
    %c0_64 = arith.constant 0 : index
    %c0_65 = arith.constant 0 : index
    %c0_66 = arith.constant 0 : index
    %140 = vector.load %arg16[%c0_63, %c0_64, %c0_65, %c0_66] : memref<1x3x8x1xf32, #tpu.memory_space<vmem>>, vector<1x3x8x1xf32>
    %141 = vector.shape_cast %140 : vector<1x3x8x1xf32> to vector<3x8x1xf32>
    %c0_67 = arith.constant 0 : index
    %c0_68 = arith.constant 0 : index
    %c0_69 = arith.constant 0 : index
    %142 = vector.load %arg17[%c0_67, %c0_68, %c0_69] : memref<1x4x8xf32, #tpu.memory_space<vmem>>, vector<1x4x8xf32>
    %143 = vector.shape_cast %142 : vector<1x4x8xf32> to vector<4x8xf32>
    %c0_70 = arith.constant 0 : index
    %c0_71 = arith.constant 0 : index
    %c0_72 = arith.constant 0 : index
    %144 = vector.load %arg18[%c0_70, %c0_71, %c0_72] : memref<1x4x1xf32, #tpu.memory_space<vmem>>, vector<1x4x1xf32>
    %145 = vector.shape_cast %144 : vector<1x4x1xf32> to vector<4x1xf32>
    %cst_73 = arith.constant dense<0.000000e+00> : vector<8x128xf32>
    %146 = tpu.matmul %131, %129, %cst_73 {dimension_numbers = #tpu.dot_dimension_numbers<[1], [0], [0], [1], [0, 0, 1, 1], [], []>} : vector<8x4xf32>, vector<4x128xf32>, vector<8x128xf32> -> vector<8x128xf32>
    %147 = vector.broadcast %133 : vector<8x1xf32> to vector<8x128xf32>
    %148 = arith.addf %146, %147 : vector<8x128xf32>
    %149 = vector.extract_strided_slice %135 {offsets = [0, 0, 0], sizes = [1, 8, 24], strides = [1, 1, 1]} : vector<3x8x24xf32> to vector<1x8x24xf32>
    %150 = vector.shape_cast %149 : vector<1x8x24xf32> to vector<8x24xf32>
    %151 = vector.extract_strided_slice %137 {offsets = [0, 0, 0], sizes = [1, 8, 1], strides = [1, 1, 1]} : vector<3x8x1xf32> to vector<1x8x1xf32>
    %152 = vector.shape_cast %151 : vector<1x8x1xf32> to vector<8x1xf32>
    %153 = vector.extract_strided_slice %139 {offsets = [0, 0, 0], sizes = [1, 8, 8], strides = [1, 1, 1]} : vector<3x8x8xf32> to vector<1x8x8xf32>
    %154 = vector.shape_cast %153 : vector<1x8x8xf32> to vector<8x8xf32>
    %155 = vector.extract_strided_slice %141 {offsets = [0, 0, 0], sizes = [1, 8, 1], strides = [1, 1, 1]} : vector<3x8x1xf32> to vector<1x8x1xf32>
    %156 = vector.shape_cast %155 : vector<1x8x1xf32> to vector<8x1xf32>
    %c1_i32_74 = arith.constant 1 : i32
    %157 = vector.broadcast %c1_i32_74 : i32 to vector<1x128xi32>
    %158 = arith.cmpi sge, %4, %157 : vector<1x128xi32>
    %c1_i32_75 = arith.constant 1 : i32
    %159 = tpu.dynamic_rotate %148 by %c1_i32_75 dim 1 : vector<8x128xf32>, i32 -> vector<8x128xf32>
    %cst_76 = arith.constant 0.000000e+00 : f32
    %160 = vector.shape_cast %158 : vector<1x128xi1> to vector<1x128xi1>
    %161 = vector.broadcast %160 : vector<1x128xi1> to vector<8x128xi1>
    %162 = vector.broadcast %cst_76 : f32 to vector<8x128xf32>
    %163 = arith.select %161, %159, %162 : vector<8x128xi1>, vector<8x128xf32>
    %c15_i32_77 = arith.constant 15 : i32
    %164 = vector.broadcast %c15_i32_77 : i32 to vector<1x128xi32>
    %165 = arith.cmpi slt, %4, %164 : vector<1x128xi32>
    %c127_i32_78 = arith.constant 127 : i32
    %166 = tpu.dynamic_rotate %148 by %c127_i32_78 dim 1 : vector<8x128xf32>, i32 -> vector<8x128xf32>
    %cst_79 = arith.constant 0.000000e+00 : f32
    %167 = vector.shape_cast %165 : vector<1x128xi1> to vector<1x128xi1>
    %168 = vector.broadcast %167 : vector<1x128xi1> to vector<8x128xi1>
    %169 = vector.broadcast %cst_79 : f32 to vector<8x128xf32>
    %170 = arith.select %168, %166, %169 : vector<8x128xi1>, vector<8x128xf32>
    %171 = tpu.concatenate %163, %148, %170 in 0 : vector<8x128xf32>, vector<8x128xf32>, vector<8x128xf32> -> vector<24x128xf32>
    %cst_80 = arith.constant dense<0.000000e+00> : vector<8x128xf32>
    %172 = tpu.matmul %150, %171, %cst_80 {dimension_numbers = #tpu.dot_dimension_numbers<[1], [0], [0], [1], [0, 0, 1, 1], [], []>} : vector<8x24xf32>, vector<24x128xf32>, vector<8x128xf32> -> vector<8x128xf32>
    %173 = vector.broadcast %152 : vector<8x1xf32> to vector<8x128xf32>
    %174 = arith.addf %172, %173 : vector<8x128xf32>
    %cst_81 = arith.constant 0.000000e+00 : f32
    %175 = vector.broadcast %cst_81 : f32 to vector<8x128xf32>
    %176 = arith.maximumf %174, %175 : vector<8x128xf32>
    %cst_82 = arith.constant dense<0.000000e+00> : vector<8x128xf32>
    %177 = tpu.matmul %154, %176, %cst_82 {dimension_numbers = #tpu.dot_dimension_numbers<[1], [0], [0], [1], [0, 0, 1, 1], [], []>} : vector<8x8xf32>, vector<8x128xf32>, vector<8x128xf32> -> vector<8x128xf32>
    %178 = vector.broadcast %156 : vector<8x1xf32> to vector<8x128xf32>
    %179 = arith.addf %177, %178 : vector<8x128xf32>
    %180 = arith.addf %148, %179 : vector<8x128xf32>
    %181 = vector.broadcast %3 : vector<1x128xf32> to vector<8x128xf32>
    %182 = arith.mulf %180, %181 : vector<8x128xf32>
    %183 = vector.extract_strided_slice %135 {offsets = [1, 0, 0], sizes = [1, 8, 24], strides = [1, 1, 1]} : vector<3x8x24xf32> to vector<1x8x24xf32>
    %184 = vector.shape_cast %183 : vector<1x8x24xf32> to vector<8x24xf32>
    %185 = vector.extract_strided_slice %137 {offsets = [1, 0, 0], sizes = [1, 8, 1], strides = [1, 1, 1]} : vector<3x8x1xf32> to vector<1x8x1xf32>
    %186 = vector.shape_cast %185 : vector<1x8x1xf32> to vector<8x1xf32>
    %187 = vector.extract_strided_slice %139 {offsets = [1, 0, 0], sizes = [1, 8, 8], strides = [1, 1, 1]} : vector<3x8x8xf32> to vector<1x8x8xf32>
    %188 = vector.shape_cast %187 : vector<1x8x8xf32> to vector<8x8xf32>
    %189 = vector.extract_strided_slice %141 {offsets = [1, 0, 0], sizes = [1, 8, 1], strides = [1, 1, 1]} : vector<3x8x1xf32> to vector<1x8x1xf32>
    %190 = vector.shape_cast %189 : vector<1x8x1xf32> to vector<8x1xf32>
    %c2_i32_83 = arith.constant 2 : i32
    %191 = vector.broadcast %c2_i32_83 : i32 to vector<1x128xi32>
    %192 = arith.cmpi sge, %4, %191 : vector<1x128xi32>
    %c2_i32_84 = arith.constant 2 : i32
    %193 = tpu.dynamic_rotate %182 by %c2_i32_84 dim 1 : vector<8x128xf32>, i32 -> vector<8x128xf32>
    %cst_85 = arith.constant 0.000000e+00 : f32
    %194 = vector.shape_cast %192 : vector<1x128xi1> to vector<1x128xi1>
    %195 = vector.broadcast %194 : vector<1x128xi1> to vector<8x128xi1>
    %196 = vector.broadcast %cst_85 : f32 to vector<8x128xf32>
    %197 = arith.select %195, %193, %196 : vector<8x128xi1>, vector<8x128xf32>
    %c14_i32_86 = arith.constant 14 : i32
    %198 = vector.broadcast %c14_i32_86 : i32 to vector<1x128xi32>
    %199 = arith.cmpi slt, %4, %198 : vector<1x128xi32>
    %c126_i32_87 = arith.constant 126 : i32
    %200 = tpu.dynamic_rotate %182 by %c126_i32_87 dim 1 : vector<8x128xf32>, i32 -> vector<8x128xf32>
    %cst_88 = arith.constant 0.000000e+00 : f32
    %201 = vector.shape_cast %199 : vector<1x128xi1> to vector<1x128xi1>
    %202 = vector.broadcast %201 : vector<1x128xi1> to vector<8x128xi1>
    %203 = vector.broadcast %cst_88 : f32 to vector<8x128xf32>
    %204 = arith.select %202, %200, %203 : vector<8x128xi1>, vector<8x128xf32>
    %205 = tpu.concatenate %197, %182, %204 in 0 : vector<8x128xf32>, vector<8x128xf32>, vector<8x128xf32> -> vector<24x128xf32>
    %cst_89 = arith.constant dense<0.000000e+00> : vector<8x128xf32>
    %206 = tpu.matmul %184, %205, %cst_89 {dimension_numbers = #tpu.dot_dimension_numbers<[1], [0], [0], [1], [0, 0, 1, 1], [], []>} : vector<8x24xf32>, vector<24x128xf32>, vector<8x128xf32> -> vector<8x128xf32>
    %207 = vector.broadcast %186 : vector<8x1xf32> to vector<8x128xf32>
    %208 = arith.addf %206, %207 : vector<8x128xf32>
    %cst_90 = arith.constant 0.000000e+00 : f32
    %209 = vector.broadcast %cst_90 : f32 to vector<8x128xf32>
    %210 = arith.maximumf %208, %209 : vector<8x128xf32>
    %cst_91 = arith.constant dense<0.000000e+00> : vector<8x128xf32>
    %211 = tpu.matmul %188, %210, %cst_91 {dimension_numbers = #tpu.dot_dimension_numbers<[1], [0], [0], [1], [0, 0, 1, 1], [], []>} : vector<8x8xf32>, vector<8x128xf32>, vector<8x128xf32> -> vector<8x128xf32>
    %212 = vector.broadcast %190 : vector<8x1xf32> to vector<8x128xf32>
    %213 = arith.addf %211, %212 : vector<8x128xf32>
    %214 = arith.addf %182, %213 : vector<8x128xf32>
    %215 = vector.broadcast %3 : vector<1x128xf32> to vector<8x128xf32>
    %216 = arith.mulf %214, %215 : vector<8x128xf32>
    %217 = vector.extract_strided_slice %135 {offsets = [2, 0, 0], sizes = [1, 8, 24], strides = [1, 1, 1]} : vector<3x8x24xf32> to vector<1x8x24xf32>
    %218 = vector.shape_cast %217 : vector<1x8x24xf32> to vector<8x24xf32>
    %219 = vector.extract_strided_slice %137 {offsets = [2, 0, 0], sizes = [1, 8, 1], strides = [1, 1, 1]} : vector<3x8x1xf32> to vector<1x8x1xf32>
    %220 = vector.shape_cast %219 : vector<1x8x1xf32> to vector<8x1xf32>
    %221 = vector.extract_strided_slice %139 {offsets = [2, 0, 0], sizes = [1, 8, 8], strides = [1, 1, 1]} : vector<3x8x8xf32> to vector<1x8x8xf32>
    %222 = vector.shape_cast %221 : vector<1x8x8xf32> to vector<8x8xf32>
    %223 = vector.extract_strided_slice %141 {offsets = [2, 0, 0], sizes = [1, 8, 1], strides = [1, 1, 1]} : vector<3x8x1xf32> to vector<1x8x1xf32>
    %224 = vector.shape_cast %223 : vector<1x8x1xf32> to vector<8x1xf32>
    %c4_i32_92 = arith.constant 4 : i32
    %225 = vector.broadcast %c4_i32_92 : i32 to vector<1x128xi32>
    %226 = arith.cmpi sge, %4, %225 : vector<1x128xi32>
    %c4_i32_93 = arith.constant 4 : i32
    %227 = tpu.dynamic_rotate %216 by %c4_i32_93 dim 1 : vector<8x128xf32>, i32 -> vector<8x128xf32>
    %cst_94 = arith.constant 0.000000e+00 : f32
    %228 = vector.shape_cast %226 : vector<1x128xi1> to vector<1x128xi1>
    %229 = vector.broadcast %228 : vector<1x128xi1> to vector<8x128xi1>
    %230 = vector.broadcast %cst_94 : f32 to vector<8x128xf32>
    %231 = arith.select %229, %227, %230 : vector<8x128xi1>, vector<8x128xf32>
    %c12_i32_95 = arith.constant 12 : i32
    %232 = vector.broadcast %c12_i32_95 : i32 to vector<1x128xi32>
    %233 = arith.cmpi slt, %4, %232 : vector<1x128xi32>
    %c124_i32_96 = arith.constant 124 : i32
    %234 = tpu.dynamic_rotate %216 by %c124_i32_96 dim 1 : vector<8x128xf32>, i32 -> vector<8x128xf32>
    %cst_97 = arith.constant 0.000000e+00 : f32
    %235 = vector.shape_cast %233 : vector<1x128xi1> to vector<1x128xi1>
    %236 = vector.broadcast %235 : vector<1x128xi1> to vector<8x128xi1>
    %237 = vector.broadcast %cst_97 : f32 to vector<8x128xf32>
    %238 = arith.select %236, %234, %237 : vector<8x128xi1>, vector<8x128xf32>
    %239 = tpu.concatenate %231, %216, %238 in 0 : vector<8x128xf32>, vector<8x128xf32>, vector<8x128xf32> -> vector<24x128xf32>
    %cst_98 = arith.constant dense<0.000000e+00> : vector<8x128xf32>
    %240 = tpu.matmul %218, %239, %cst_98 {dimension_numbers = #tpu.dot_dimension_numbers<[1], [0], [0], [1], [0, 0, 1, 1], [], []>} : vector<8x24xf32>, vector<24x128xf32>, vector<8x128xf32> -> vector<8x128xf32>
    %241 = vector.broadcast %220 : vector<8x1xf32> to vector<8x128xf32>
    %242 = arith.addf %240, %241 : vector<8x128xf32>
    %cst_99 = arith.constant 0.000000e+00 : f32
    %243 = vector.broadcast %cst_99 : f32 to vector<8x128xf32>
    %244 = arith.maximumf %242, %243 : vector<8x128xf32>
    %cst_100 = arith.constant dense<0.000000e+00> : vector<8x128xf32>
    %245 = tpu.matmul %222, %244, %cst_100 {dimension_numbers = #tpu.dot_dimension_numbers<[1], [0], [0], [1], [0, 0, 1, 1], [], []>} : vector<8x8xf32>, vector<8x128xf32>, vector<8x128xf32> -> vector<8x128xf32>
    %246 = vector.broadcast %224 : vector<8x1xf32> to vector<8x128xf32>
    %247 = arith.addf %245, %246 : vector<8x128xf32>
    %248 = arith.addf %216, %247 : vector<8x128xf32>
    %249 = vector.broadcast %3 : vector<1x128xf32> to vector<8x128xf32>
    %250 = arith.mulf %248, %249 : vector<8x128xf32>
    %cst_101 = arith.constant dense<0.000000e+00> : vector<4x128xf32>
    %251 = tpu.matmul %143, %250, %cst_101 {dimension_numbers = #tpu.dot_dimension_numbers<[1], [0], [0], [1], [0, 0, 1, 1], [], []>} : vector<4x8xf32>, vector<8x128xf32>, vector<4x128xf32> -> vector<4x128xf32>
    %252 = vector.broadcast %145 : vector<4x1xf32> to vector<4x128xf32>
    %253 = arith.addf %251, %252 : vector<4x128xf32>
    %254 = vector.broadcast %3 : vector<1x128xf32> to vector<4x128xf32>
    %255 = arith.mulf %253, %254 : vector<4x128xf32>
    %256 = arith.negf %255 : vector<4x128xf32>
    %257 = math.exp %256 : vector<4x128xf32>
    %cst_102 = arith.constant 1.000000e+00 : f32
    %258 = vector.broadcast %cst_102 : f32 to vector<4x128xf32>
    %259 = arith.addf %258, %257 : vector<4x128xf32>
    %260 = arith.divf %258, %259 : vector<4x128xf32>
    %c0_103 = arith.constant 0 : index
    %c0_104 = arith.constant 0 : index
    %c0_105 = arith.constant 0 : index
    %261 = vector.load %arg19[%c0_103, %c0_104, %c0_105] : memref<1x4x128xf32, #tpu.memory_space<vmem>>, vector<1x4x128xf32>
    %262 = vector.shape_cast %261 : vector<1x4x128xf32> to vector<4x128xf32>
    %263 = vector.shape_cast %260 : vector<4x128xf32> to vector<1x4x128xf32>
    tpu.vector_store %arg19[%c0_103, %c0_104, %c0_105], %263 {strides = array<i32>} : memref<1x4x128xf32, #tpu.memory_space<vmem>>, vector<1x4x128xf32>,
    return
  }
  func.func @transform_0(%arg0: i32) -> (i32, i32, i32) {
    %c0_i32 = arith.constant 0 : i32
    %c0_i32_0 = arith.constant 0 : i32
    %c0_i32_1 = arith.constant 0 : i32
    return %arg0, %c0_i32, %c0_i32_0 : i32, i32, i32
  }
  func.func @transform_1(%arg0: i32) -> (i32, i32, i32) {
    %c0_i32 = arith.constant 0 : i32
    %c0_i32_0 = arith.constant 0 : i32
    %c0_i32_1 = arith.constant 0 : i32
    return %arg0, %c0_i32, %c0_i32_0 : i32, i32, i32
  }
  func.func @transform_2(%arg0: i32) -> (i32, i32) {
    %c0_i32 = arith.constant 0 : i32
    %c0_i32_0 = arith.constant 0 : i32
    %c0_i32_1 = arith.constant 0 : i32
    return %c0_i32, %c0_i32_0 : i32, i32
  }
  func.func @transform_3(%arg0: i32) -> (i32, i32) {
    %c0_i32 = arith.constant 0 : i32
    %c0_i32_0 = arith.constant 0 : i32
    %c0_i32_1 = arith.constant 0 : i32
    return %c0_i32, %c0_i32_0 : i32, i32
  }
  func.func @transform_4(%arg0: i32) -> (i32, i32, i32) {
    %c0_i32 = arith.constant 0 : i32
    %c0_i32_0 = arith.constant 0 : i32
    %c0_i32_1 = arith.constant 0 : i32
    %c0_i32_2 = arith.constant 0 : i32
    return %c0_i32, %c0_i32_0, %c0_i32_1 : i32, i32, i32
  }
  func.func @transform_5(%arg0: i32) -> (i32, i32, i32) {
    %c0_i32 = arith.constant 0 : i32
    %c0_i32_0 = arith.constant 0 : i32
    %c0_i32_1 = arith.constant 0 : i32
    %c0_i32_2 = arith.constant 0 : i32
    return %c0_i32, %c0_i32_0, %c0_i32_1 : i32, i32, i32
  }
  func.func @transform_6(%arg0: i32) -> (i32, i32, i32) {
    %c0_i32 = arith.constant 0 : i32
    %c0_i32_0 = arith.constant 0 : i32
    %c0_i32_1 = arith.constant 0 : i32
    %c0_i32_2 = arith.constant 0 : i32
    return %c0_i32, %c0_i32_0, %c0_i32_1 : i32, i32, i32
  }
  func.func @transform_7(%arg0: i32) -> (i32, i32, i32) {
    %c0_i32 = arith.constant 0 : i32
    %c0_i32_0 = arith.constant 0 : i32
    %c0_i32_1 = arith.constant 0 : i32
    %c0_i32_2 = arith.constant 0 : i32
    return %c0_i32, %c0_i32_0, %c0_i32_1 : i32, i32, i32
  }
  func.func @transform_8(%arg0: i32) -> (i32, i32) {
    %c0_i32 = arith.constant 0 : i32
    %c0_i32_0 = arith.constant 0 : i32
    %c0_i32_1 = arith.constant 0 : i32
    return %c0_i32, %c0_i32_0 : i32, i32
  }
  func.func @transform_9(%arg0: i32) -> (i32, i32) {
    %c0_i32 = arith.constant 0 : i32
    %c0_i32_0 = arith.constant 0 : i32
    %c0_i32_1 = arith.constant 0 : i32
    return %c0_i32, %c0_i32_0 : i32, i32
  }
  func.func @transform_10(%arg0: i32) -> (i32, i32, i32) {
    %c0_i32 = arith.constant 0 : i32
    %c0_i32_0 = arith.constant 0 : i32
    %c0_i32_1 = arith.constant 0 : i32
    %c0_i32_2 = arith.constant 0 : i32
    return %c0_i32, %c0_i32_0, %c0_i32_1 : i32, i32, i32
  }
  func.func @transform_11(%arg0: i32) -> (i32, i32, i32) {
    %c0_i32 = arith.constant 0 : i32
    %c0_i32_0 = arith.constant 0 : i32
    %c0_i32_1 = arith.constant 0 : i32
    %c0_i32_2 = arith.constant 0 : i32
    return %c0_i32, %c0_i32_0, %c0_i32_1 : i32, i32, i32
  }
  func.func @transform_12(%arg0: i32) -> (i32, i32, i32, i32) {
    %c0_i32 = arith.constant 0 : i32
    %c0_i32_0 = arith.constant 0 : i32
    %c0_i32_1 = arith.constant 0 : i32
    %c0_i32_2 = arith.constant 0 : i32
    %c0_i32_3 = arith.constant 0 : i32
    return %c0_i32, %c0_i32_0, %c0_i32_1, %c0_i32_2 : i32, i32, i32, i32
  }
  func.func @transform_13(%arg0: i32) -> (i32, i32, i32, i32) {
    %c0_i32 = arith.constant 0 : i32
    %c0_i32_0 = arith.constant 0 : i32
    %c0_i32_1 = arith.constant 0 : i32
    %c0_i32_2 = arith.constant 0 : i32
    %c0_i32_3 = arith.constant 0 : i32
    return %c0_i32, %c0_i32_0, %c0_i32_1, %c0_i32_2 : i32, i32, i32, i32
  }
  func.func @transform_14(%arg0: i32) -> (i32, i32, i32, i32) {
    %c0_i32 = arith.constant 0 : i32
    %c0_i32_0 = arith.constant 0 : i32
    %c0_i32_1 = arith.constant 0 : i32
    %c0_i32_2 = arith.constant 0 : i32
    %c0_i32_3 = arith.constant 0 : i32
    return %c0_i32, %c0_i32_0, %c0_i32_1, %c0_i32_2 : i32, i32, i32, i32
  }
  func.func @transform_15(%arg0: i32) -> (i32, i32, i32, i32) {
    %c0_i32 = arith.constant 0 : i32
    %c0_i32_0 = arith.constant 0 : i32
    %c0_i32_1 = arith.constant 0 : i32
    %c0_i32_2 = arith.constant 0 : i32
    %c0_i32_3 = arith.constant 0 : i32
    return %c0_i32, %c0_i32_0, %c0_i32_1, %c0_i32_2 : i32, i32, i32, i32
  }
  func.func @transform_16(%arg0: i32) -> (i32, i32, i32) {
    %c0_i32 = arith.constant 0 : i32
    %c0_i32_0 = arith.constant 0 : i32
    %c0_i32_1 = arith.constant 0 : i32
    %c0_i32_2 = arith.constant 0 : i32
    return %c0_i32, %c0_i32_0, %c0_i32_1 : i32, i32, i32
  }
  func.func @transform_17(%arg0: i32) -> (i32, i32, i32) {
    %c0_i32 = arith.constant 0 : i32
    %c0_i32_0 = arith.constant 0 : i32
    %c0_i32_1 = arith.constant 0 : i32
    %c0_i32_2 = arith.constant 0 : i32
    return %c0_i32, %c0_i32_0, %c0_i32_1 : i32, i32, i32
  }
  func.func @transform_18(%arg0: i32) -> (i32, i32, i32) {
    %c0_i32 = arith.constant 0 : i32
    %c0_i32_0 = arith.constant 0 : i32
    %c0_i32_1 = arith.constant 0 : i32
    return %arg0, %c0_i32, %c0_i32_0 : i32, i32, i32
  }
}

</mosaic_0001>

<bundles_post_ra>
// kernel: tpu_custom_call.1
= control target key start
LH: loop header
LB: loop body
LE: loop exit
PB: predicated region body
PF: predicated region fallthrough
CT: control target
= control target key end

     0   :  { %s2800_s0 = inlined_call_operand.vmem [shape: f32[2,4,128], index: 0, kind: input, shape index: {}]   ;;  %s2801_s1 = inlined_call_operand.vmem [shape: f32[2,1,128], index: 1, kind: input, shape index: {}]   ;;  %s2802_s2 = inlined_call_operand.vmem [shape: f32[8,4], index: 2, kind: input, shape index: {}]   ;;  %s2803_s3 = inlined_call_operand.vmem [shape: f32[8,1], index: 3, kind: input, shape index: {}]   ;;  %s2804_s4 = inlined_call_operand.vmem [shape: f32[3,8,24], index: 4, kind: input, shape index: {}]   ;;  %s2805_s5 = inlined_call_operand.vmem [shape: f32[3,8,1], index: 5, kind: input, shape index: {}]   ;;  %s2806_s6 = inlined_call_operand.vmem [shape: f32[3,8,8], index: 6, kind: input, shape index: {}]   ;;  %s2807_s7 = inlined_call_operand.vmem [shape: f32[3,8,1], index: 7, kind: input, shape index: {}]   ;;  %s2808_s8 = inlined_call_operand.vmem [shape: f32[4,8], index: 8, kind: input, shape index: {}]   ;;  %s2809_s9 = inlined_call_operand.vmem [shape: f32[4,1], index: 9, kind: input, shape index: {}]   ;;  %s2810_s10 = inlined_call_operand.vmem [shape: f32[1,8,4], index: 10, kind: input, shape index: {}]   ;;  %s2811_s11 = inlined_call_operand.vmem [shape: f32[1,8,1], index: 11, kind: input, shape index: {}]   ;;  %s2812_s12 = inlined_call_operand.vmem [shape: f32[1,3,8,24], index: 12, kind: input, shape index: {}]   ;;  %s2813_s13 = inlined_call_operand.vmem [shape: f32[1,3,8,1], index: 13, kind: input, shape index: {}]   ;;  %s2814_s14 = inlined_call_operand.vmem [shape: f32[1,3,8,8], index: 14, kind: input, shape index: {}]   ;;  %s2815_s15 = inlined_call_operand.vmem [shape: f32[1,3,8,1], index: 15, kind: input, shape index: {}]   ;;  %s2816_s16 = inlined_call_operand.vmem [shape: f32[1,4,8], index: 16, kind: input, shape index: {}]   ;;  %s2817_s17 = inlined_call_operand.vmem [shape: f32[1,4,1], index: 17, kind: input, shape index: {}]   ;;  %s2818_s18 = inlined_call_operand.hbm [shape: f32[2,4,128], index: 18, kind: output, shape index: {}]  }
   0x1   :  { %2826 = sst [smem:[#allocation8_spill]] %s2800_s0 }
   0x2   :  { %2827 = sst [smem:[#allocation9_spill]] %s2801_s1 }
   0x3   :  { %2828 = sst [smem:[#allocation10_spill]] %s2802_s2 }
   0x4   :  { %2829 = sst [smem:[#allocation11_spill]] %s2803_s3 }
   0x5   :  { %2830 = sst [smem:[#allocation12_spill]] %s2804_s4 }
   0x6   :  { %2831 = sst [smem:[#allocation13_spill]] %s2805_s5 }
   0x7   :  { %23 = vsyncpa [#allocation3], 0 }
   0x8   :  { %25 = vsyncpa [#allocation3 + $0x1], 0  ;;  %s2471_s27 = smov 0   ;;  %s2473_s28 = smov 0  }
   0x9   :  { %s2475_s29 = smov 0   ;;  %s2477_s30 = smov 0  }
   0xa LB: > { %2832 = sst [smem:[#allocation5_spill]] %s2360_s29  ;;  %s2492_s0 = sadd.s32 4294967295, %s2364_s30   ;;  %s2364_s30 = sphi %s2477_s30, %s2847_s30   ;;  %s2360_s29 = sphi %s2475_s29, %s2849_s29   ;;  %s2356_s28 = sphi %s2473_s28, %s2851_s28   ;;  %s2352_s27 = sphi %s2471_s27, %s2850_s27  }
   0xb   : > { %s2055_s19 = sadd.s32 4294967294, %s2364_s30   ;;  %s2496_s1 = sadd.s32 1, %s2364_s30  }
   0xc   : > { %2833 = sst [smem:[#allocation6_spill]] %s2496_s1  ;;  %s426_s20 = sadd.s32 1, %s2360_s29 }
   0xd   : > { %s423_s21 = ssub.s32 %s2364_s30, %s2496_s1  ;;  %p436_p0 = scmp.ne.s32.totalorder %s2360_s29, %s2356_s28 }
   0xe   : > { %p424_p1 = scmp.eq.s32.totalorder %s423_s21, 0  ;;  %p437_p2 = scmp.eq.s32.totalorder %s2492_s0, 1 }
   0xf   : > { %p442_p3 = scmp.ne.s32.totalorder %s2356_s28, %s2352_s27  ;;  %p443_p4 = scmp.eq.s32.totalorder %s2055_s19, 1 }
  0x10   : > { %s2507_s22 = scalar_select %p424_p1, %s2360_s29, %s426_s20  }
  0x11   : > { %p2509_p5 = por %p437_p2, %p436_p0  ;;  %p2513_p6 = por %p443_p4, %p442_p3 }
  0x12   : > { %2834 = sst [smem:[#allocation7_spill]] %s2507_s22  ;;  %p2058_p7 = scmp.ge.s32.totalorder %s2364_s30, 1 }
  0x13   : > { %p522_p8 = scmp.lt.s32.totalorder %s2364_s30, 3 }
  0x15   : > { %p523_p9 = pnand %p2058_p7, %p522_p8 }
  0x16   : > { %p578_p10 = scmp.lt.s32.totalorder (!%p523_p9), %s2492_s0, 1  ;;  %s2837_s3 = sld [smem:[#allocation11_spill]] (!%p523_p9) }
  0x17   : > { %526 = sbr.rel (%p523_p9) target bundleno = 4004 (0xfa4), region = 92  ;;  %s2838_s22 = sld [smem:[#allocation8_spill]] (!%p523_p9) }
  0x18   : > { %s2840_s5 = sld [smem:[#allocation13_spill]] (!%p523_p9)  ;;  %s2843_s20 = smov (!%p523_p9), 1  }
  0x19   : > { %s2841_s4 = sld [smem:[#allocation12_spill]] (!%p523_p9)  ;;  %s2845_s1 = smov (!%p523_p9), 2  }
  0x1a   : > { %s2842_s24 = sld [smem:[#allocation9_spill]] (!%p523_p9) }
  0x1c   : > { %v2366_v0 = vmov 0.0   ;;  %vm2367_vm0 = vmmov 0   ;;  %v590_v1 = vld [vmem:[%s2837_s3] sm:$0xff]  ;;  %s2527_s26 = scalar_select %p578_p10, %s2492_s0, 1  ;;  %v2368_v2 = vmov 0   ;;  %vm614_vm1 = vcmask 1043456  }
  0x1d   : > { %2142 = vmatprep.subr.mxu0 %v2366_v0  ;;  %2144 = vmatprep.mubr.msk.f32.mxu0 %vm2367_vm0, %v2366_v0  ;;  %s2839_s3 = sld [smem:[#allocation10_spill]]  ;;  %vm610_vm2 = vcmask 31744   ;;  %v600_v9 = vld [vmem:[%s2807_s7] sm:$0xff]  ;;  %v587_v11 = vlaneseq  ;;  %vm705_vm5 = vcmask 195584   ;;  %vm785_vm6 = vcmask 64512   ;;  %v601_v29 = vld [vmem:[%s2807_s7 + $0x8] sm:$0xff] }
  0x1e   : > { %2294 = vset.pattern.permute.xlu0 %v2368_v2  ;;  %2147 = vmatprep.subr.mxu1 %v2366_v0  ;;  %s2060_s19 = sshll.u32 %s2527_s26, 2  ;;  %v594_v10 = vld [vmem:[%s2840_s5] sm:$0xff]  ;;  %v595_v30 = vld [vmem:[%s2840_s5 + $0x8] sm:$0xff]  ;;  %v602_v46 = vld [vmem:[%s2807_s7 + $0x10] sm:$0xff] }
  0x1f   : > { %607 = vperm.xlu0 %2294, %v590_v1   ;;  %2153 = vmatprep.mubr.msk.f32.mxu1 %vm2367_vm0, %v2366_v0  ;;  %s581_s29 = scalar_lea.vmem %s2838_s22, %s2060_s19  ;;  %s2821_s22 = smov 1   ;;  %v2552_v12 = vand.u32 127, %v587_v11  ;;  %v591_v14 = vld [vmem:[%s2841_s4] sm:$0xff]  ;;  %v592_v32 = vld [vmem:[%s2841_s4 + $0x8] sm:$0xff]  ;;  %v596_v47 = vld [vmem:[%s2840_s5 + $0x10] sm:$0xff] }
  0x20   : > { %2295 = vset.pattern.permute.xlu1 %v2368_v2  ;;  %v585_v4 = vld [vmem:[%s581_s29] sm:$0xf]  ;;  %s2820_s19 = smov 127   ;;  %s584_s25 = scalar_lea.vmem %s2842_s24, %s2527_s26  ;;  %v598_v39 = vld [vmem:[%s2806_s6 + $0x8] sm:$0xff]  ;;  %v593_v51 = vld [vmem:[%s2841_s4 + $0x10] sm:$0xff] }
  0x21   : > { %2143 = vmatpush3.msk.msra.mxu0 %vm614_vm1, %v585_v4  ;;  %vm694_vm3 = vcmp.lt.s32.totalorder %v2552_v12, 15  ;;  %vm688_vm4 = vcmp.ge.s32.totalorder %v2552_v12, 1  ;;  %v597_v21 = vld [vmem:[%s2806_s6] sm:$0xff]  ;;  %s2822_s29 = smov 126   ;;  %vm873_vm7 = vcmp.lt.s32.totalorder %v2552_v12, 14  ;;  %vm867_vm8 = vcmp.ge.s32.totalorder %v2552_v12, 2 }
  0x22   : > { %2156 = vmatprep.subr.mxu0 %v2366_v0  ;;  %v2580_v25 = vld [vmem:[%s584_s25] ss:$0 sm:$0xff]  ;;  %s2373_s25 = smov 4   ;;  %s2374_s26 = smov 124   ;;  %vm1044_vm9 = vcmp.lt.s32.totalorder %v2552_v12, 12  ;;  %vm1038_vm10 = vcmp.ge.s32.totalorder %v2552_v12, 4 }
  0x23   : > { %v589_v3 = vld [vmem:[%s2839_s3] sm:$0xff]  ;;  %s2823_s3 = smov 2   ;;  %v599_v58 = vld [vmem:[%s2806_s6 + $0x10] sm:$0xff]  ;;  %s2375_s4 = smov [#allocation2]  }
  0x24   : > { %2145 = vmatmul.mubr.msk.f32.vlgmr.msra.gmra.mxu0 %vm610_vm2, %v589_v3  ;;  %v1296_v48 = vld [vmem:[%s2811_s11] sm:$0xff]  ;;  %s2308_s5 = sshll.u32 %s2375_s4, 4  ;;  %s2309_s5 = int_to_ptr.vmem [resolvable:$false] %s2308_s5 }
  0x25   : > { %2158 = vmatprep.mubr.msk.f32.mxu0 %vm2367_vm0, %v2366_v0  ;;  %v604_v49 = vld [vmem:[%s2809_s9] sm:$0xf] }
  0x26   : > { %v603_v2 = vld [vmem:[%s2808_s8] sm:$0xf] }
  0x9a   : > { %v608_v5 = vpop.permute.xlu0 %607 }
  0xe4   : > { %v684_v6 = vpop.f32.mrf.mxu0 }
  0xe5   : > { %v685_v7 = vadd.f32 %v684_v6, %v608_v5 }
  0xe6   : > { %v2146_v8 = vpop.f32.mrf.mxu0 }
  0xe7   : > { %689 = vrot.lane.b32.xlu1 %v685_v7, %s2821_s22  ;;  %695 = vrot.lane.b32.xlu0 %v685_v7, %s2820_s19  ;;  %s575_s19 = sand.u32 1, %s2356_s28  }
  0xe8   : > { %s2059_s24 = sshll.u32 %s575_s19, 2  ;;  %s1974_s21 = scalar_lea.sflag [#allocation3], %s575_s19 }
  0xeb   : > { %782 = vperm.xlu0 %2294, %v600_v9   ;;  %702 = vperm.xlu1 %2295, %v594_v10  }
 0x159   : > { %v696_v13 = vpop.permute.xlu0 %695  ;;  %v690_v15 = vpop.permute.xlu1 %689 }
 0x15a   : > { %2148 = vmatpush3.msk.msra.mxu1 %vm694_vm3, %v696_v13 }
 0x15b   : > { %2149 = vmatprep.subr.mxu1 %v2366_v0 }
 0x15c   : > { %2150 = vmatpush3.msra.mxu1 %v685_v7 }
 0x15d   : > { %2151 = vmatprep.subr.mxu1 %v2366_v0 }
 0x15e   : > { %2152 = vmatpush3.msk.msra.mxu1 %vm688_vm4, %v690_v15 }
 0x15f   : > { %2154 = vmatmul.mubr.msk.f32.vlgmr.msra.gmra.mxu1 %vm705_vm5, %v591_v14  ;;  %2170 = vmatprep.subr.mxu1 %v2366_v0  ;;  %v1295_v14 = vld [vmem:[%s2810_s10] sm:$0xff] }
 0x160   : > { %2172 = vmatprep.mubr.msk.f32.mxu1 %vm2367_vm0, %v2366_v0 }
 0x166   : > { %v703_v16 = vpop.permute.xlu1 %702  ;;  %v783_v22 = vpop.permute.xlu0 %782 }
 0x21f   : > { %v775_v17 = vpop.f32.mrf.mxu1 }
 0x220   : > { %v776_v18 = vadd.f32 %v775_v17, %v703_v16 }
 0x221   : > { %v2155_v19 = vpop.f32.mrf.mxu1 }
 0x222   : > { %v779_v20 = vmax.f32 %v776_v18, 0.0  ;;  %v1306_v19 = vld [vmem:[%s2815_s15] sm:$0xff] }
 0x224   : > { %2157 = vmatpush3.msra.mxu0 %v779_v20  ;;  %v1300_v20 = vld [vmem:[%s2813_s13] sm:$0xff] }
 0x225   : > { %2159 = vmatmul.mubr.msk.f32.vlgmr.msra.gmra.mxu0 %vm785_vm6, %v597_v21  ;;  %2161 = vmatprep.subr.mxu0 %v2366_v0 }
 0x226   : > { %2167 = vmatprep.mubr.msk.f32.mxu0 %vm2367_vm0, %v2366_v0 }
 0x2e5   : > { %v855_v23 = vpop.f32.mrf.mxu0 }
 0x2e6   : > { %v856_v24 = vadd.f32 %v855_v23, %v783_v22  ;;  %v1297_v22 = vld [vmem:[%s2812_s12] sm:$0xff] }
 0x2e7   : > { %v2160_v26 = vpop.f32.mrf.mxu0 }
 0x2e8   : > { %v859_v27 = vadd.f32 %v856_v24, %v685_v7 }
 0x2ea   : > { %v866_v28 = vmul.f32 %v2580_v25, %v859_v27 }
 0x2ec   : > { %868 = vrot.lane.b32.xlu0 %v866_v28, %s2823_s3  ;;  %874 = vrot.lane.b32.xlu1 %v866_v28, %s2822_s29  ;;  %s2844_s29 = smov 127   ;;  %s2846_s3 = smov 126  }
 0x2f0   : > { %960 = vperm.xlu0 %2294, %v601_v29   ;;  %881 = vperm.xlu1 %2295, %v595_v30   ;;  %v1303_v30 = vld [vmem:[%s2814_s14] sm:$0xff] }
 0x35e   : > { %v875_v31 = vpop.permute.xlu1 %874  ;;  %v869_v33 = vpop.permute.xlu0 %868 }
 0x35f   : > { %2162 = vmatpush3.msk.msra.mxu0 %vm873_vm7, %v875_v31 }
 0x360   : > { %2163 = vmatprep.subr.mxu0 %v2366_v0 }
 0x361   : > { %2164 = vmatpush3.msra.mxu0 %v866_v28 }
 0x362   : > { %2165 = vmatprep.subr.mxu0 %v2366_v0 }
 0x363   : > { %2166 = vmatpush3.msk.msra.mxu0 %vm867_vm8, %v869_v33 }
 0x364   : > { %2168 = vmatmul.mubr.msk.f32.vlgmr.msra.gmra.mxu0 %vm705_vm5, %v592_v32  ;;  %2184 = vmatprep.subr.mxu0 %v2366_v0 }
 0x365   : > { %2186 = vmatprep.mubr.msk.f32.mxu0 %vm2367_vm0, %v2366_v0 }
 0x36b   : > { %v882_v34 = vpop.permute.xlu1 %881  ;;  %v961_v40 = vpop.permute.xlu0 %960 }
 0x424   : > { %v953_v35 = vpop.f32.mrf.mxu0 }
 0x425   : > { %v954_v36 = vadd.f32 %v953_v35, %v882_v34 }
 0x426   : > { %v2169_v37 = vpop.f32.mrf.mxu0 }
 0x427   : > { %v957_v38 = vmax.f32 %v954_v36, 0.0  ;;  %v1307_v37 = vld [vmem:[%s2815_s15 + $0x8] sm:$0xff] }
 0x429   : > { %2171 = vmatpush3.msra.mxu1 %v957_v38  ;;  %v1301_v38 = vld [vmem:[%s2813_s13 + $0x8] sm:$0xff] }
 0x42a   : > { %2173 = vmatmul.mubr.msk.f32.vlgmr.msra.gmra.mxu1 %vm785_vm6, %v598_v39  ;;  %2175 = vmatprep.subr.mxu1 %v2366_v0 }
 0x42b   : > { %2181 = vmatprep.mubr.msk.f32.mxu1 %vm2367_vm0, %v2366_v0 }
 0x4ea   : > { %v1032_v41 = vpop.f32.mrf.mxu1 }
 0x4eb   : > { %v1033_v42 = vadd.f32 %v1032_v41, %v961_v40  ;;  %v1298_v40 = vld [vmem:[%s2812_s12 + $0x8] sm:$0xff] }
 0x4ec   : > { %v2174_v43 = vpop.f32.mrf.mxu1 }
 0x4ed   : > { %v1036_v44 = vadd.f32 %v1033_v42, %v866_v28 }
 0x4ef   : > { %v1037_v45 = vmul.f32 %v2580_v25, %v1036_v44 }
 0x4f1   : > { %1039 = vrot.lane.b32.xlu0 %v1037_v45, %s2373_s25  ;;  %1045 = vrot.lane.b32.xlu1 %v1037_v45, %s2374_s26 }
 0x4f5   : > { %1131 = vperm.xlu0 %2294, %v602_v46   ;;  %1052 = vperm.xlu1 %2295, %v596_v47   ;;  %v1304_v47 = vld [vmem:[%s2814_s14 + $0x8] sm:$0xff] }
 0x4f9   : > { %1313 = vperm.xlu0 %2294, %v1296_v48   ;;  %1211 = vperm.xlu1 %2295, %v604_v49  }
 0x563   : > { %v1046_v50 = vpop.permute.xlu1 %1045  ;;  %v1040_v52 = vpop.permute.xlu0 %1039 }
 0x564   : > { %2176 = vmatpush3.msk.msra.mxu1 %vm1044_vm9, %v1046_v50 }
 0x565   : > { %2177 = vmatprep.subr.mxu1 %v2366_v0 }
 0x566   : > { %2178 = vmatpush3.msra.mxu1 %v1037_v45 }
 0x567   : > { %2179 = vmatprep.subr.mxu1 %v2366_v0 }
 0x568   : > { %2180 = vmatpush3.msk.msra.mxu1 %vm1038_vm10, %v1040_v52 }
 0x569   : > { %2182 = vmatmul.mubr.msk.f32.vlgmr.msra.gmra.mxu1 %vm705_vm5, %v593_v51  ;;  %2194 = vmatprep.subr.mxu1 %v2366_v0 }
 0x56a   : > { %2196 = vmatprep.mubr.msk.f32.mxu1 %vm2367_vm0, %v2366_v0 }
 0x570   : > { %v1053_v53 = vpop.permute.xlu1 %1052  ;;  %v1132_v59 = vpop.permute.xlu0 %1131 }
 0x574   : > { %v1212_v3 = vpop.permute.xlu1 %1211  ;;  %v1314_v15 = vpop.permute.xlu0 %1313 }
 0x629   : > { %v1124_v54 = vpop.f32.mrf.mxu1 }
 0x62a   : > { %v1125_v55 = vadd.f32 %v1124_v54, %v1053_v53  ;;  %v1308_v54 = vld [vmem:[%s2815_s15 + $0x10] sm:$0xff] }
 0x62b   : > { %v2183_v56 = vpop.f32.mrf.mxu1 }
 0x62c   : > { %v1128_v57 = vmax.f32 %v1125_v55, 0.0  ;;  %v1302_v55 = vld [vmem:[%s2813_s13 + $0x10] sm:$0xff]  ;;  %v1310_v56 = vld [vmem:[%s2817_s17] sm:$0xf] }
 0x62e   : > { %2185 = vmatpush3.msra.mxu0 %v1128_v57 }
 0x62f   : > { %2187 = vmatmul.mubr.msk.f32.vlgmr.msra.gmra.mxu0 %vm785_vm6, %v599_v58  ;;  %2189 = vmatprep.subr.mxu0 %v2366_v0  ;;  %v1299_v58 = vld [vmem:[%s2812_s12 + $0x10] sm:$0xff] }
 0x630   : > { %2191 = vmatprep.mubr.msk.f32.mxu0 %vm2367_vm0, %v2366_v0 }
 0x6ef   : > { %v1203_v60 = vpop.f32.mrf.mxu0 }
 0x6f0   : > { %v1204_v61 = vadd.f32 %v1203_v60, %v1132_v59 }
 0x6f1   : > { %v2188_v62 = vpop.f32.mrf.mxu0 }
 0x6f2   : > { %v1207_v63 = vadd.f32 %v1204_v61, %v1037_v45 }
 0x6f4   : > { %v1208_v1 = vmul.f32 %v2580_v25, %v1207_v63 }
 0x6f6   : > { %2190 = vmatpush3.msra.mxu0 %v1208_v1 }
 0x6f7   : > { %2192 = vmatmul.mubr.msk.f32.vlgmr.msra.gmra.mxu0 %vm785_vm6, %v603_v2  ;;  %2199 = vmatprep.subr.mxu0 %v2366_v0  ;;  %v1305_v2 = vld [vmem:[%s2814_s14 + $0x10] sm:$0xff] }
 0x6f8   : > { %2205 = vmatprep.mubr.msk.f32.mxu0 %vm2367_vm0, %v2366_v0 }
 0x7b7   : > { %v1283_v4 = vpop.f32.mrf.mxu0 }
 0x7b8   : > { %v1284_v5 = vadd.f32 %v1283_v4, %v1212_v3 }
 0x7b9   : > { %v2193_v6 = vpop.f32.mrf.mxu0 }
 0x7ba   : > { %v1287_v7 = vmul.f32 %v2580_v25, %v1284_v5 }
 0x7bc   : > { %v2077_v8 = vmul.f32 -1.442695, %v1287_v7 }
 0x7be   : > { %2296 = vpow2.f32 %v2077_v8  ;;  %v1309_v8 = vld [vmem:[%s2816_s16] sm:$0xf] }
 0x7cb   : > { %v2297_v9 = vpop.eup %2296 }
 0x7cc   : > { %v1291_v10 = vadd.f32 1.0, %v2297_v9 }
 0x7ce   : > { %2298 = vrcp.f32 %v1291_v10 }
 0x7db   : > { %v2299_v11 = vpop.eup %2298 }
 0x7dc   : > { %v1294_v13 = vmul.f32 %v2299_v11, %v2580_v25 }
 0x7de   : > { %2195 = vmatpush3.msk.msra.mxu1 %vm614_vm1, %v1294_v13 }
 0x7df   : > { %2197 = vmatmul.mubr.msk.f32.vlgmr.msra.gmra.mxu1 %vm610_vm2, %v1295_v14  ;;  %2208 = vmatprep.subr.mxu1 %v2366_v0 }
 0x7e0   : > { %2210 = vmatprep.mubr.msk.f32.mxu1 %vm2367_vm0, %v2366_v0 }
 0x89f   : > { %v1388_v16 = vpop.f32.mrf.mxu1 }
 0x8a0   : > { %v1389_v17 = vadd.f32 %v1388_v16, %v1314_v15 }
 0x8a1   : > { %v2198_v18 = vpop.f32.mrf.mxu1 }
 0x8a2   : > { %1392 = vrot.lane.b32.xlu0 %v1389_v17, %s2843_s20  ;;  %1395 = vrot.lane.b32.xlu1 %v1389_v17, %s2844_s29  ;;  %s2095_s20 = sshll.u32 %s2492_s0, 6  ;;  %s577_s29 = scalar_lea.vmem [#allocation2], %s2059_s24 }
 0x8a3   : > { %s2310_s0 = scalar_lea.vmem %s2309_s5, 128 }
 0x8a6   : > { %1479 = vperm.xlu0 %2294, %v1306_v19   ;;  %1400 = vperm.xlu1 %2295, %v1300_v20  }
 0x914   : > { %v1396_v21 = vpop.permute.xlu1 %1395  ;;  %v1393_v23 = vpop.permute.xlu0 %1392 }
 0x915   : > { %2200 = vmatpush3.msk.msra.mxu0 %vm694_vm3, %v1396_v21 }
 0x916   : > { %2201 = vmatprep.subr.mxu0 %v2366_v0 }
 0x917   : > { %2202 = vmatpush3.msra.mxu0 %v1389_v17 }
 0x918   : > { %2203 = vmatprep.subr.mxu0 %v2366_v0 }
 0x919   : > { %2204 = vmatpush3.msk.msra.mxu0 %vm688_vm4, %v1393_v23 }
 0x91a   : > { %2206 = vmatmul.mubr.msk.f32.vlgmr.msra.gmra.mxu0 %vm705_vm5, %v1297_v22  ;;  %2222 = vmatprep.subr.mxu0 %v2366_v0 }
 0x91b   : > { %2224 = vmatprep.mubr.msk.f32.mxu0 %vm2367_vm0, %v2366_v0 }
 0x921   : > { %v1401_v24 = vpop.permute.xlu1 %1400  ;;  %v1480_v31 = vpop.permute.xlu0 %1479 }
 0x9da   : > { %v1472_v26 = vpop.f32.mrf.mxu0 }
 0x9db   : > { %v1473_v27 = vadd.f32 %v1472_v26, %v1401_v24 }
 0x9dc   : > { %v2207_v28 = vpop.f32.mrf.mxu0 }
 0x9dd   : > { %v1476_v29 = vmax.f32 %v1473_v27, 0.0 }
 0x9df   : > { %2209 = vmatpush3.msra.mxu1 %v1476_v29 }
 0x9e0   : > { %2211 = vmatmul.mubr.msk.f32.vlgmr.msra.gmra.mxu1 %vm785_vm6, %v1303_v30  ;;  %2213 = vmatprep.subr.mxu1 %v2366_v0 }
 0x9e1   : > { %2219 = vmatprep.mubr.msk.f32.mxu1 %vm2367_vm0, %v2366_v0 }
 0xaa0   : > { %v1551_v32 = vpop.f32.mrf.mxu1 }
 0xaa1   : > { %v1552_v33 = vadd.f32 %v1551_v32, %v1480_v31 }
 0xaa2   : > { %v2212_v34 = vpop.f32.mrf.mxu1 }
 0xaa3   : > { %v1555_v35 = vadd.f32 %v1552_v33, %v1389_v17 }
 0xaa5   : > { %v1556_v36 = vmul.f32 %v2580_v25, %v1555_v35 }
 0xaa7   : > { %1557 = vrot.lane.b32.xlu0 %v1556_v36, %s2845_s1  ;;  %1560 = vrot.lane.b32.xlu1 %v1556_v36, %s2846_s3  ;;  %s2765_s3 = scalar_lea.hbm %s2818_s18, %s2095_s20 }
 0xaab   : > { %1644 = vperm.xlu0 %2294, %v1307_v37   ;;  %1565 = vperm.xlu1 %2295, %v1301_v38  }
 0xb19   : > { %v1561_v39 = vpop.permute.xlu1 %1560  ;;  %v1558_v41 = vpop.permute.xlu0 %1557 }
 0xb1a   : > { %2214 = vmatpush3.msk.msra.mxu1 %vm873_vm7, %v1561_v39 }
 0xb1b   : > { %2215 = vmatprep.subr.mxu1 %v2366_v0 }
 0xb1c   : > { %2216 = vmatpush3.msra.mxu1 %v1556_v36 }
 0xb1d   : > { %2217 = vmatprep.subr.mxu1 %v2366_v0 }
 0xb1e   : > { %2218 = vmatpush3.msk.msra.mxu1 %vm867_vm8, %v1558_v41 }
 0xb1f   : > { %2220 = vmatmul.mubr.msk.f32.vlgmr.msra.gmra.mxu1 %vm705_vm5, %v1298_v40  ;;  %2236 = vmatprep.subr.mxu1 %v2366_v0 }
 0xb20   : > { %2238 = vmatprep.mubr.msk.f32.mxu1 %vm2367_vm0, %v2366_v0 }
 0xb26   : > { %v1566_v42 = vpop.permute.xlu1 %1565  ;;  %v1645_v48 = vpop.permute.xlu0 %1644 }
 0xbdf   : > { %v1637_v43 = vpop.f32.mrf.mxu1 }
 0xbe0   : > { %v1638_v44 = vadd.f32 %v1637_v43, %v1566_v42 }
 0xbe1   : > { %v2221_v45 = vpop.f32.mrf.mxu1 }
 0xbe2   : > { %v1641_v46 = vmax.f32 %v1638_v44, 0.0 }
 0xbe4   : > { %2223 = vmatpush3.msra.mxu0 %v1641_v46 }
 0xbe5   : > { %2225 = vmatmul.mubr.msk.f32.vlgmr.msra.gmra.mxu0 %vm785_vm6, %v1304_v47  ;;  %2227 = vmatprep.subr.mxu0 %v2366_v0 }
 0xbe6   : > { %2233 = vmatprep.mubr.msk.f32.mxu0 %vm2367_vm0, %v2366_v0 }
 0xca5   : > { %v1716_v49 = vpop.f32.mrf.mxu0 }
 0xca6   : > { %v1717_v50 = vadd.f32 %v1716_v49, %v1645_v48 }
 0xca7   : > { %v2226_v51 = vpop.f32.mrf.mxu0 }
 0xca8   : > { %v1720_v52 = vadd.f32 %v1717_v50, %v1556_v36 }
 0xcaa   : > { %v1721_v53 = vmul.f32 %v2580_v25, %v1720_v52 }
 0xcac   : > { %1722 = vrot.lane.b32.xlu0 %v1721_v53, %s2373_s25  ;;  %1725 = vrot.lane.b32.xlu1 %v1721_v53, %s2374_s26  ;;  %s1987_s25 = sshll.u32 %s577_s29, 4  ;;  %s1988_s25 = int_to_ptr.vmem [resolvable:$true] %s1987_s25 }
 0xcad   : > { %s2304_s22 = scalar_lea.vmem %s1988_s25, 64  ;;  %p2311_p0 = scmp.lt.s32.totalorder %s1988_s25, %s2309_s5 }
 0xcae   : > { %p2305_p11 = scmp.ne.s32.totalorder %s1988_s25, %s2304_s22  ;;  %p2312_p1 = scmp.lt.s32.totalorder %s2310_s0, %s2304_s22 }
 0xcb0   : > { %1809 = vperm.xlu0 %2294, %v1308_v54   ;;  %1730 = vperm.xlu1 %2295, %v1302_v55   ;;  %p2306_p12 = pnand %p2305_p11, %p2509_p5  ;;  %p2313_p2 = por %p2312_p1, %p2311_p0 }
 0xcb2   : > { %p2307_p13 = pneg %p2306_p12 }
 0xcb4   : > { %1889 = vperm.xlu1 %2295, %v1310_v56   ;;  %p2314_p3 = pnand %p2313_p2, %p2307_p13 }
 0xd1e   : > { %v1726_v57 = vpop.permute.xlu1 %1725  ;;  %v1723_v59 = vpop.permute.xlu0 %1722 }
 0xd1f   : > { %2228 = vmatpush3.msk.msra.mxu0 %vm1044_vm9, %v1726_v57 }
 0xd20   : > { %2229 = vmatprep.subr.mxu0 %v2366_v0 }
 0xd21   : > { %2230 = vmatpush3.msra.mxu0 %v1721_v53 }
 0xd22   : > { %2231 = vmatprep.subr.mxu0 %v2366_v0 }
 0xd23   : > { %2232 = vmatpush3.msk.msra.mxu0 %vm1038_vm10, %v1723_v59 }
 0xd24   : > { %2234 = vmatmul.mubr.msk.f32.vlgmr.msra.gmra.mxu0 %vm705_vm5, %v1299_v58 }
 0xd2b   : > { %v1731_v60 = vpop.permute.xlu1 %1730  ;;  %v1810_v12 = vpop.permute.xlu0 %1809 }
 0xd2f   : > { %v1890_v9 = vpop.permute.xlu1 %1889 }
 0xde4   : > { %v1802_v61 = vpop.f32.mrf.mxu0 }
 0xde5   : > { %v1803_v62 = vadd.f32 %v1802_v61, %v1731_v60 }
 0xde6   : > { %v2235_v63 = vpop.f32.mrf.mxu0 }
 0xde7   : > { %v1806_v1 = vmax.f32 %v1803_v62, 0.0 }
 0xde9   : > { %2237 = vmatpush3.msra.mxu1 %v1806_v1 }
 0xdea   : > { %2239 = vmatmul.mubr.msk.f32.vlgmr.msra.gmra.mxu1 %vm785_vm6, %v1305_v2  ;;  %2241 = vmatprep.subr.mxu1 %v2366_v0 }
 0xdeb   : > { %2243 = vmatprep.mubr.msk.f32.mxu1 %vm2367_vm0, %v2366_v0 }
 0xeaa   : > { %v1881_v3 = vpop.f32.mrf.mxu1 }
 0xeab   : > { %v1882_v4 = vadd.f32 %v1881_v3, %v1810_v12 }
 0xeac   : > { %v2240_v5 = vpop.f32.mrf.mxu1 }
 0xead   : > { %v1885_v6 = vadd.f32 %v1882_v4, %v1721_v53 }
 0xeaf   : > { %v1886_v7 = vmul.f32 %v2580_v25, %v1885_v6 }
 0xeb1   : > { %2242 = vmatpush3.msra.mxu1 %v1886_v7 }
 0xeb2   : > { %2244 = vmatmul.mubr.msk.f32.vlgmr.msra.gmra.mxu1 %vm785_vm6, %v1309_v8 }
 0xf72   : > { %v1961_v10 = vpop.f32.mrf.mxu1 }
 0xf73   : > { %v1962_v11 = vadd.f32 %v1961_v10, %v1890_v9 }
 0xf74   : > { %v2245_v0 = vpop.f32.mrf.mxu1 }
 0xf75   : > { %v1965_v13 = vmul.f32 %v2580_v25, %v1962_v11 }
 0xf77   : > { %v2093_v14 = vmul.f32 -1.442695, %v1965_v13 }
 0xf79   : > { %2300 = vpow2.f32 %v2093_v14 }
 0xf86   : > { %v2301_v15 = vpop.eup %2300 }
 0xf87   : > { %v1969_v16 = vadd.f32 1.0, %v2301_v15 }
 0xf89   : > { %2302 = vrcp.f32 %v1969_v16 }
 0xf96   : > { %v2303_v17 = vpop.eup %2302 }
 0xf97   : > { %1972 = vst [vmem:[%s577_s29] sm:$0xf] %v2303_v17 }
 0xf98   : > { %2317 = shalt.err (!%p2314_p3)
}
 0xf99   : > { %s2318_s24 = scalar_lea.hbm %s2765_s3, 64  ;;  %s2322_s4 = scalar_lea.hbm %s2818_s18, 128 }
 0xf9a   : > { %p2319_p4 = scmp.ne.s32.totalorder %s2765_s3, %s2318_s24  ;;  %p2323_p9 = scmp.lt.s32.totalorder %s2765_s3, %s2818_s18 }
 0xf9b   : > { %p2324_p10 = scmp.lt.s32.totalorder %s2322_s4, %s2318_s24 }
 0xf9c   : > { %p2320_p7 = pnand %p2319_p4, %p2509_p5 }
 0xf9d   : > { %p2325_p11 = por %p2324_p10, %p2323_p9 }
 0xf9e   : > { %p2321_p8 = pneg %p2320_p7 }
 0xfa0   : > { %p2326_p12 = pnand %p2325_p11, %p2321_p8 }
 0xfa2   : > { %2329 = shalt.err (!%p2326_p12)
}
 0xfa3   : > { %2246 = dma.vmem_to_hbm [thread:$0]  (%p2509_p5), %s1988_s25, 64, %s2765_s3, %s1974_s21  }
 0xfa4 PF: > { %p2252_p13 = scmp.ge.s32.totalorder %s2364_s30, 2  ;;  %s1999_s5 = sand.u32 1, %s2352_s27  }
 0xfa5   : > { %s2000_s1 = scalar_lea.sflag [#allocation3], %s1999_s5 }
 0xfa6   : > { %p2249_p0 = pnand %p2252_p13, %p2513_p6 }
 0xfa8   : > { %p2250_p1 = pneg %p2249_p0 }
 0xfaa   : > { %2347 = dma.done.wait (%p2250_p1), %s2000_s1, 64  }
 0xfab   : > { %2349 = vsyncadd (%p2250_p1), %s2000_s1, 4294967232  ;;  %s2847_s30 = sld [smem:[#allocation6_spill]]  ;;  %s2850_s27 = smov %s2356_s28 }
 0xfac   : > { %s2848_s22 = sld [smem:[#allocation5_spill]] }
 0xfad   : > { %s2849_s29 = sld [smem:[#allocation7_spill]] }
 0xfb1   : > { %p28_p2 = scmp.ge.s32.totalorder %s2847_s30, 4  }
 0xfb2   : > { %s2851_s28 = smov %s2848_s22 }
 0xfb3   :  { %30 = sbr.rel (!%p28_p2) target bundleno = 10 (0xa), region = 130 }
 0xfb8   :  { %2005 = vsyncpa [#allocation3], 1 }
 0xfb9   :  { %2007 = vsyncpa [#allocation3 + $0x1], 1 }

</bundles_post_ra>
